<compile_context>
chip_gen: v6e
topology: v6e:2x2x1
jax: 0.10.0
libtpu: 0.0.40
codegen_flags: <defaults>
</compile_context>

<pallas_src>
from typing import List

import jax
import jax.numpy as jnp
from jax.experimental import pallas as pl
from jax.experimental.pallas import tpu as pltpu

NEG_SLOPE = 0.01  # F.leaky_relu default negative_slope


def _leaky_relu(v):
    return jnp.where(v > 0, v, NEG_SLOPE * v)


def _round_up(n, m):
    return ((n + m - 1) // m) * m


def make_discriminator_kernel(kernel_sizes: List[int], out_channels: int,
                              batch_tile: int, t_pad: int, seq_len: int):
    """Build the Pallas kernel body (one grid step == one batch tile)."""
    K = len(kernel_sizes)
    max_ks = max(kernel_sizes)

    def kernel(*refs):
        # refs = [x, (conv_w_k, conv_b_k) * K, w1, b1, w2, b2, out]
        x_ref = refs[0]
        conv_refs = refs[1:1 + 2 * K]
        w1_ref, b1_ref, w2_ref, b2_ref = refs[1 + 2 * K:1 + 2 * K + 4]
        out_ref = refs[1 + 2 * K + 4]

        x2 = x_ref[...]                       # (TB*T_pad, D), native dtype
        rows, D = x2.shape

        # Row-shifted copies of x (shared across all kernel sizes). Rows that
        # read past the tile are zero; they only land at masked positions.
        shifts = [x2]
        for j in range(1, max_ks):
            shifted = jnp.concatenate(
                [x2[j:, :], jnp.zeros((j, D), x2.dtype)], axis=0)
            shifts.append(shifted)

        pooled = []
        for k, ks in enumerate(kernel_sizes):
            w = conv_refs[2 * k][...]                            # (ks*D, C)
            cb = conv_refs[2 * k + 1][...].astype(jnp.float32)   # (1, C)
            To = seq_len - ks + 1                                # valid positions
            # im2col: (TB*T_pad, ks*D) — one MXU matmul per kernel size.
            x_unfold = jnp.concatenate(shifts[:ks], axis=1)
            conv = jnp.dot(x_unfold, w,
                           preferred_element_type=jnp.float32)   # (rows, C) f32
            act = _leaky_relu(conv + cb)
            act3 = act.reshape(batch_tile, t_pad, out_channels)
            t_idx = jax.lax.broadcasted_iota(
                jnp.int32, (batch_tile, t_pad, out_channels), 1)
            masked = jnp.where(t_idx < To, act3, -jnp.inf)
            pooled.append(jnp.max(masked, axis=1))               # (TB, C) max_pool1d

        feats = jnp.concatenate(pooled, axis=1)                  # (TB, C*K)
        # TODO(synk): nn.Dropout is stochastic in train mode; implemented here
        # with eval-mode (identity) semantics.
        w1 = w1_ref[...]
        h = jnp.dot(feats.astype(w1.dtype), w1,
                    preferred_element_type=jnp.float32)
        h = _leaky_relu(h + b1_ref[...].astype(jnp.float32))     # (TB, 128)
        w2 = w2_ref[...]
        out = jnp.dot(h.astype(w2.dtype), w2,
                      preferred_element_type=jnp.float32)
        out = out + b2_ref[...].astype(jnp.float32)              # (TB, N_pad)
        out_ref[...] = out.astype(out_ref.dtype)

    return kernel


def cnn_discriminator_forward(x, params, kernel_sizes, out_channels, num_classes,
                              batch_tile=None):
    B, T, D = x.shape

    t_pad = _round_up(T, 8)
    if batch_tile is None:
        # For very large T*D shrink this (VMEM: ~2 * TB*T_pad*D*itemsize for x).
        batch_tile = min(128, _round_up(B, 8))
    TB = batch_tile
    b_pad = _round_up(B, TB)
    n_pad = _round_up(num_classes, 128)   # lane-dense output store

    # Pad batch/time with zeros (masked / sliced away), flatten batch+time.
    xp = jnp.pad(x, ((0, b_pad - B), (0, t_pad - T), (0, 0)))
    x2 = xp.reshape(b_pad * t_pad, D)

    # im2col weight layout + lane-padded final projection.
    conv_ws = [w.reshape(ks * D, out_channels)
               for w, ks in zip(params["conv_w"], kernel_sizes)]
    w2p = jnp.pad(params["w2"], ((0, 0), (0, n_pad - num_classes)))
    b2p = jnp.pad(params["b2"], ((0, 0), (0, n_pad - num_classes)))

    inputs = [x2]
    in_specs = [pl.BlockSpec((TB * t_pad, D), lambda b: (b, 0))]
    for w, bias in zip(conv_ws, params["conv_b"]):
        inputs += [w, bias]
        in_specs += [pl.BlockSpec(w.shape, lambda b: (0, 0)),
                     pl.BlockSpec(bias.shape, lambda b: (0, 0))]
    inputs += [params["w1"], params["b1"], w2p, b2p]
    in_specs += [pl.BlockSpec(params["w1"].shape, lambda b: (0, 0)),
                 pl.BlockSpec(params["b1"].shape, lambda b: (0, 0)),
                 pl.BlockSpec(w2p.shape, lambda b: (0, 0)),
                 pl.BlockSpec(b2p.shape, lambda b: (0, 0))]

    kernel = make_discriminator_kernel(kernel_sizes, out_channels, TB, t_pad, T)

    out = pl.pallas_call(
        kernel,
        out_shape=jax.ShapeDtypeStruct((b_pad, n_pad), x.dtype),
        grid_spec=pltpu.PrefetchScalarGridSpec(
            num_scalar_prefetch=0,
            grid=(b_pad // TB,),
            in_specs=in_specs,
            out_specs=pl.BlockSpec((TB, n_pad), lambda b: (b, 0)),
        ),
        compiler_params=pltpu.CompilerParams(
            dimension_semantics=("parallel",),      # megacore-sharded batch axis
            vmem_limit_bytes=32 * 1024 * 1024,
        ),
    )(*inputs)

    return out[:B, :num_classes]


def init_params(key, kernel_sizes, out_channels, hidden_size, num_classes,
                hidden_units=128):
    """Deterministic synthetic parameters (shapes match the nn.Module)."""
    keys = jax.random.split(key, 2 * len(kernel_sizes) + 4)
    conv_w, conv_b = [], []
    for i, ks in enumerate(kernel_sizes):
        conv_w.append(jax.random.uniform(
            keys[2 * i], (ks, hidden_size, out_channels),
            jnp.float32, -0.1, 0.1))
        conv_b.append(jax.random.uniform(
            keys[2 * i + 1], (1, out_channels), jnp.float32, -0.1, 0.1))
    off = 2 * len(kernel_sizes)
    w1 = jax.random.uniform(keys[off], (out_channels * len(kernel_sizes),
                                        hidden_units), jnp.float32, -0.1, 0.1)
    b1 = jax.random.uniform(keys[off + 1], (1, hidden_units), jnp.float32, -0.1, 0.1)
    w2 = jax.random.uniform(keys[off + 2], (hidden_units, num_classes),
                            jnp.float32, -0.1, 0.1)
    b2 = jax.random.uniform(keys[off + 3], (1, num_classes), jnp.float32, -0.1, 0.1)
    return {"conv_w": conv_w, "conv_b": conv_b,
            "w1": w1, "b1": b1, "w2": w2, "b2": b2}


def reference_forward(x, params, kernel_sizes, out_channels):
    """Pure-JAX reference (mirrors the PyTorch forward, dropout in eval mode)."""
    B, T, D = x.shape
    feats = []
    for k, ks in enumerate(kernel_sizes):
        w = params["conv_w"][k]                      # (ks, D, C)
        b = params["conv_b"][k]                      # (1, C)
        To = T - ks + 1
        acc = jnp.zeros((B, To, out_channels), jnp.float32)
        for j in range(ks):
            acc = acc + jnp.einsum("btd,dc->btc", x[:, j:j + To, :], w[j])
        acc = _leaky_relu(acc + b[None, :, :])
        feats.append(jnp.max(acc, axis=1))           # (B, C)
    f = jnp.concatenate(feats, axis=1)               # (B, C*K)
    h = _leaky_relu(f @ params["w1"] + params["b1"])
    return h @ params["w2"] + params["b2"]


if __name__ == "__main__":
    # Small shapes consistent with the module's forward.
    B, T, D = 2, 8, 32                # batch, seq_len, hidden_size
    out_channels = 4                  # number of filters per kernel size
    kernel_sizes = [2, 3, 4]
    num_classes = 2

    key = jax.random.PRNGKey(0)
    kx, kp = jax.random.split(key)
    x = jax.random.normal(kx, (B, T, D), jnp.float32)
    params = init_params(kp, kernel_sizes, out_channels, D, num_classes)

    out = cnn_discriminator_forward(x, params, kernel_sizes, out_channels,
                                    num_classes)
    out = jax.block_until_ready(out)

    ref = reference_forward(x, params, kernel_sizes, out_channels)
    assert out.shape == (B, num_classes)
    assert jnp.allclose(out, ref, atol=1e-4, rtol=1e-4), (out, ref)

    print("KERNEL_OK")
</pallas_src>

<mosaic_0001>
module attributes {stable_mosaic.version = 11 : i64} {
  func.func @kernel(%arg0: i32, %arg1: memref<64x32xf32, #tpu.memory_space<vmem>>, %arg2: memref<64x4xf32, #tpu.memory_space<vmem>>, %arg3: memref<1x4xf32, #tpu.memory_space<vmem>>, %arg4: memref<96x4xf32, #tpu.memory_space<vmem>>, %arg5: memref<1x4xf32, #tpu.memory_space<vmem>>, %arg6: memref<128x4xf32, #tpu.memory_space<vmem>>, %arg7: memref<1x4xf32, #tpu.memory_space<vmem>>, %arg8: memref<12x128xf32, #tpu.memory_space<vmem>>, %arg9: memref<1x128xf32, #tpu.memory_space<vmem>>, %arg10: memref<128x128xf32, #tpu.memory_space<vmem>>, %arg11: memref<1x128xf32, #tpu.memory_space<vmem>>, %arg12: memref<8x128xf32, #tpu.memory_space<vmem>>) attributes {dimension_semantics = [#tpu.dimension_semantics<parallel>], iteration_bounds = array<i64: 1>, scalar_prefetch = 0 : i64, scratch_operands = 0 : i64, tpu.core_type = #tpu.core_type<tc>, window_params = [{transform_indices = @transform_0, window_bounds = array<i64: 64, 32>}, {pipeline_mode = #tpu.pipeline_mode<synchronous>, transform_indices = @transform_1, window_bounds = array<i64: 64, 4>}, {pipeline_mode = #tpu.pipeline_mode<synchronous>, transform_indices = @transform_2, window_bounds = array<i64: 1, 4>}, {pipeline_mode = #tpu.pipeline_mode<synchronous>, transform_indices = @transform_3, window_bounds = array<i64: 96, 4>}, {pipeline_mode = #tpu.pipeline_mode<synchronous>, transform_indices = @transform_4, window_bounds = array<i64: 1, 4>}, {pipeline_mode = #tpu.pipeline_mode<synchronous>, transform_indices = @transform_5, window_bounds = array<i64: 128, 4>}, {pipeline_mode = #tpu.pipeline_mode<synchronous>, transform_indices = @transform_6, window_bounds = array<i64: 1, 4>}, {pipeline_mode = #tpu.pipeline_mode<synchronous>, transform_indices = @transform_7, window_bounds = array<i64: 12, 128>}, {pipeline_mode = #tpu.pipeline_mode<synchronous>, transform_indices = @transform_8, window_bounds = array<i64: 1, 128>}, {pipeline_mode = #tpu.pipeline_mode<synchronous>, transform_indices = @transform_9, window_bounds = array<i64: 128, 128>}, {pipeline_mode = #tpu.pipeline_mode<synchronous>, transform_indices = @transform_10, window_bounds = array<i64: 1, 128>}, {transform_indices = @transform_11, window_bounds = array<i64: 8, 128>}]} {
    %c0 = arith.constant 0 : index
    %c0_0 = arith.constant 0 : index
    %0 = vector.load %arg1[%c0, %c0_0] : memref<64x32xf32, #tpu.memory_space<vmem>>, vector<64x32xf32>
    %1 = vector.extract_strided_slice %0 {offsets = [1, 0], sizes = [63, 32], strides = [1, 1]} : vector<64x32xf32> to vector<63x32xf32>
    %cst = arith.constant 0.000000e+00 : f32
    %2 = vector.broadcast %cst : f32 to vector<1x32xf32>
    %3 = tpu.concatenate %1, %2 in 0 : vector<63x32xf32>, vector<1x32xf32> -> vector<64x32xf32>
    %4 = vector.extract_strided_slice %0 {offsets = [2, 0], sizes = [62, 32], strides = [1, 1]} : vector<64x32xf32> to vector<62x32xf32>
    %cst_1 = arith.constant 0.000000e+00 : f32
    %5 = vector.broadcast %cst_1 : f32 to vector<2x32xf32>
    %6 = tpu.concatenate %4, %5 in 0 : vector<62x32xf32>, vector<2x32xf32> -> vector<64x32xf32>
    %7 = vector.extract_strided_slice %0 {offsets = [3, 0], sizes = [61, 32], strides = [1, 1]} : vector<64x32xf32> to vector<61x32xf32>
    %cst_2 = arith.constant 0.000000e+00 : f32
    %8 = vector.broadcast %cst_2 : f32 to vector<3x32xf32>
    %9 = tpu.concatenate %7, %8 in 0 : vector<61x32xf32>, vector<3x32xf32> -> vector<64x32xf32>
    %c0_3 = arith.constant 0 : index
    %c0_4 = arith.constant 0 : index
    %10 = vector.load %arg2[%c0_3, %c0_4] : memref<64x4xf32, #tpu.memory_space<vmem>>, vector<64x4xf32>
    %c0_5 = arith.constant 0 : index
    %c0_6 = arith.constant 0 : index
    %11 = vector.load %arg3[%c0_5, %c0_6] : memref<1x4xf32, #tpu.memory_space<vmem>>, vector<1x4xf32>
    %12 = tpu.concatenate %0, %3 in 1 : vector<64x32xf32>, vector<64x32xf32> -> vector<64x64xf32>
    %cst_7 = arith.constant dense<0.000000e+00> : vector<64x4xf32>
    %13 = tpu.matmul %12, %10, %cst_7 {dimension_numbers = #tpu.dot_dimension_numbers<[1], [0], [0], [1], [0, 0, 1, 1], [], []>} : vector<64x64xf32>, vector<64x4xf32>, vector<64x4xf32> -> vector<64x4xf32>
    %14 = vector.broadcast %11 : vector<1x4xf32> to vector<64x4xf32>
    %15 = arith.addf %13, %14 : vector<64x4xf32>
    %cst_8 = arith.constant 0.000000e+00 : f32
    %16 = vector.broadcast %cst_8 : f32 to vector<64x4xf32>
    %17 = arith.cmpf ogt, %15, %16 : vector<64x4xf32>
    %cst_9 = arith.constant 0.00999999977 : f32
    %18 = vector.broadcast %cst_9 : f32 to vector<64x4xf32>
    %19 = arith.mulf %18, %15 : vector<64x4xf32>
    %20 = arith.select %17, %15, %19 : vector<64x4xi1>, vector<64x4xf32>
    %21 = vector.shape_cast %20 : vector<64x4xf32> to vector<8x8x4xf32>
    %22 = tpu.iota {dimensions = array<i32: 1>} : vector<8x8x4xi32>
    %c7_i32 = arith.constant 7 : i32
    %23 = vector.broadcast %c7_i32 : i32 to vector<8x8x4xi32>
    %24 = arith.cmpi slt, %22, %23 : vector<8x8x4xi32>
    %cst_10 = arith.constant 0xFF800000 : f32
    %25 = vector.broadcast %cst_10 : f32 to vector<8x8x4xf32>
    %26 = arith.select %24, %21, %25 : vector<8x8x4xi1>, vector<8x8x4xf32>
    %cst_11 = arith.constant dense<0xFF800000> : vector<8x4xf32>
    %27 = vector.multi_reduction <maximumf>, %26, %cst_11 [1] : vector<8x8x4xf32> to vector<8x4xf32>
    %c0_12 = arith.constant 0 : index
    %c0_13 = arith.constant 0 : index
    %28 = vector.load %arg4[%c0_12, %c0_13] : memref<96x4xf32, #tpu.memory_space<vmem>>, vector<96x4xf32>
    %c0_14 = arith.constant 0 : index
    %c0_15 = arith.constant 0 : index
    %29 = vector.load %arg5[%c0_14, %c0_15] : memref<1x4xf32, #tpu.memory_space<vmem>>, vector<1x4xf32>
    %30 = tpu.concatenate %0, %3, %6 in 1 : vector<64x32xf32>, vector<64x32xf32>, vector<64x32xf32> -> vector<64x96xf32>
    %cst_16 = arith.constant dense<0.000000e+00> : vector<64x4xf32>
    %31 = tpu.matmul %30, %28, %cst_16 {dimension_numbers = #tpu.dot_dimension_numbers<[1], [0], [0], [1], [0, 0, 1, 1], [], []>} : vector<64x96xf32>, vector<96x4xf32>, vector<64x4xf32> -> vector<64x4xf32>
    %32 = vector.broadcast %29 : vector<1x4xf32> to vector<64x4xf32>
    %33 = arith.addf %31, %32 : vector<64x4xf32>
    %cst_17 = arith.constant 0.000000e+00 : f32
    %34 = vector.broadcast %cst_17 : f32 to vector<64x4xf32>
    %35 = arith.cmpf ogt, %33, %34 : vector<64x4xf32>
    %cst_18 = arith.constant 0.00999999977 : f32
    %36 = vector.broadcast %cst_18 : f32 to vector<64x4xf32>
    %37 = arith.mulf %36, %33 : vector<64x4xf32>
    %38 = arith.select %35, %33, %37 : vector<64x4xi1>, vector<64x4xf32>
    %39 = vector.shape_cast %38 : vector<64x4xf32> to vector<8x8x4xf32>
    %40 = tpu.iota {dimensions = array<i32: 1>} : vector<8x8x4xi32>
    %c6_i32 = arith.constant 6 : i32
    %41 = vector.broadcast %c6_i32 : i32 to vector<8x8x4xi32>
    %42 = arith.cmpi slt, %40, %41 : vector<8x8x4xi32>
    %cst_19 = arith.constant 0xFF800000 : f32
    %43 = vector.broadcast %cst_19 : f32 to vector<8x8x4xf32>
    %44 = arith.select %42, %39, %43 : vector<8x8x4xi1>, vector<8x8x4xf32>
    %cst_20 = arith.constant dense<0xFF800000> : vector<8x4xf32>
    %45 = vector.multi_reduction <maximumf>, %44, %cst_20 [1] : vector<8x8x4xf32> to vector<8x4xf32>
    %c0_21 = arith.constant 0 : index
    %c0_22 = arith.constant 0 : index
    %46 = vector.load %arg6[%c0_21, %c0_22] : memref<128x4xf32, #tpu.memory_space<vmem>>, vector<128x4xf32>
    %c0_23 = arith.constant 0 : index
    %c0_24 = arith.constant 0 : index
    %47 = vector.load %arg7[%c0_23, %c0_24] : memref<1x4xf32, #tpu.memory_space<vmem>>, vector<1x4xf32>
    %48 = tpu.concatenate %0, %3, %6, %9 in 1 : vector<64x32xf32>, vector<64x32xf32>, vector<64x32xf32>, vector<64x32xf32> -> vector<64x128xf32>
    %cst_25 = arith.constant dense<0.000000e+00> : vector<64x4xf32>
    %49 = tpu.matmul %48, %46, %cst_25 {dimension_numbers = #tpu.dot_dimension_numbers<[1], [0], [0], [1], [0, 0, 1, 1], [], []>} : vector<64x128xf32>, vector<128x4xf32>, vector<64x4xf32> -> vector<64x4xf32>
    %50 = vector.broadcast %47 : vector<1x4xf32> to vector<64x4xf32>
    %51 = arith.addf %49, %50 : vector<64x4xf32>
    %cst_26 = arith.constant 0.000000e+00 : f32
    %52 = vector.broadcast %cst_26 : f32 to vector<64x4xf32>
    %53 = arith.cmpf ogt, %51, %52 : vector<64x4xf32>
    %cst_27 = arith.constant 0.00999999977 : f32
    %54 = vector.broadcast %cst_27 : f32 to vector<64x4xf32>
    %55 = arith.mulf %54, %51 : vector<64x4xf32>
    %56 = arith.select %53, %51, %55 : vector<64x4xi1>, vector<64x4xf32>
    %57 = vector.shape_cast %56 : vector<64x4xf32> to vector<8x8x4xf32>
    %58 = tpu.iota {dimensions = array<i32: 1>} : vector<8x8x4xi32>
    %c5_i32 = arith.constant 5 : i32
    %59 = vector.broadcast %c5_i32 : i32 to vector<8x8x4xi32>
    %60 = arith.cmpi slt, %58, %59 : vector<8x8x4xi32>
    %cst_28 = arith.constant 0xFF800000 : f32
    %61 = vector.broadcast %cst_28 : f32 to vector<8x8x4xf32>
    %62 = arith.select %60, %57, %61 : vector<8x8x4xi1>, vector<8x8x4xf32>
    %cst_29 = arith.constant dense<0xFF800000> : vector<8x4xf32>
    %63 = vector.multi_reduction <maximumf>, %62, %cst_29 [1] : vector<8x8x4xf32> to vector<8x4xf32>
    %64 = tpu.concatenate %27, %45, %63 in 1 : vector<8x4xf32>, vector<8x4xf32>, vector<8x4xf32> -> vector<8x12xf32>
    %c0_30 = arith.constant 0 : index
    %c0_31 = arith.constant 0 : index
    %65 = vector.load %arg8[%c0_30, %c0_31] : memref<12x128xf32, #tpu.memory_space<vmem>>, vector<12x128xf32>
    %cst_32 = arith.constant dense<0.000000e+00> : vector<8x128xf32>
    %66 = tpu.matmul %64, %65, %cst_32 {dimension_numbers = #tpu.dot_dimension_numbers<[1], [0], [0], [1], [0, 0, 1, 1], [], []>} : vector<8x12xf32>, vector<12x128xf32>, vector<8x128xf32> -> vector<8x128xf32>
    %c0_33 = arith.constant 0 : index
    %c0_34 = arith.constant 0 : index
    %67 = vector.load %arg9[%c0_33, %c0_34] : memref<1x128xf32, #tpu.memory_space<vmem>>, vector<1x128xf32>
    %68 = vector.broadcast %67 : vector<1x128xf32> to vector<8x128xf32>
    %69 = arith.addf %66, %68 : vector<8x128xf32>
    %cst_35 = arith.constant 0.000000e+00 : f32
    %70 = vector.broadcast %cst_35 : f32 to vector<8x128xf32>
    %71 = arith.cmpf ogt, %69, %70 : vector<8x128xf32>
    %cst_36 = arith.constant 0.00999999977 : f32
    %72 = vector.broadcast %cst_36 : f32 to vector<8x128xf32>
    %73 = arith.mulf %72, %69 : vector<8x128xf32>
    %74 = arith.select %71, %69, %73 : vector<8x128xi1>, vector<8x128xf32>
    %c0_37 = arith.constant 0 : index
    %c0_38 = arith.constant 0 : index
    %75 = vector.load %arg10[%c0_37, %c0_38] : memref<128x128xf32, #tpu.memory_space<vmem>>, vector<128x128xf32>
    %cst_39 = arith.constant dense<0.000000e+00> : vector<8x128xf32>
    %76 = tpu.matmul %74, %75, %cst_39 {dimension_numbers = #tpu.dot_dimension_numbers<[1], [0], [0], [1], [0, 0, 1, 1], [], []>} : vector<8x128xf32>, vector<128x128xf32>, vector<8x128xf32> -> vector<8x128xf32>
    %c0_40 = arith.constant 0 : index
    %c0_41 = arith.constant 0 : index
    %77 = vector.load %arg11[%c0_40, %c0_41] : memref<1x128xf32, #tpu.memory_space<vmem>>, vector<1x128xf32>
    %78 = vector.broadcast %77 : vector<1x128xf32> to vector<8x128xf32>
    %79 = arith.addf %76, %78 : vector<8x128xf32>
    %c0_42 = arith.constant 0 : index
    %c0_43 = arith.constant 0 : index
    %80 = vector.load %arg12[%c0_42, %c0_43] : memref<8x128xf32, #tpu.memory_space<vmem>>, vector<8x128xf32>
    tpu.vector_store %arg12[%c0_42, %c0_43], %79 {strides = array<i32>} : memref<8x128xf32, #tpu.memory_space<vmem>>, vector<8x128xf32>,
    return
  }
  func.func @transform_0(%arg0: i32) -> (i32, i32) {
    %c0_i32 = arith.constant 0 : i32
    %c0_i32_0 = arith.constant 0 : i32
    return %arg0, %c0_i32 : i32, i32
  }
  func.func @transform_1(%arg0: i32) -> (i32, i32) {
    %c0_i32 = arith.constant 0 : i32
    %c0_i32_0 = arith.constant 0 : i32
    %c0_i32_1 = arith.constant 0 : i32
    return %c0_i32, %c0_i32_0 : i32, i32
  }
  func.func @transform_2(%arg0: i32) -> (i32, i32) {
    %c0_i32 = arith.constant 0 : i32
    %c0_i32_0 = arith.constant 0 : i32
    %c0_i32_1 = arith.constant 0 : i32
    return %c0_i32, %c0_i32_0 : i32, i32
  }
  func.func @transform_3(%arg0: i32) -> (i32, i32) {
    %c0_i32 = arith.constant 0 : i32
    %c0_i32_0 = arith.constant 0 : i32
    %c0_i32_1 = arith.constant 0 : i32
    return %c0_i32, %c0_i32_0 : i32, i32
  }
  func.func @transform_4(%arg0: i32) -> (i32, i32) {
    %c0_i32 = arith.constant 0 : i32
    %c0_i32_0 = arith.constant 0 : i32
    %c0_i32_1 = arith.constant 0 : i32
    return %c0_i32, %c0_i32_0 : i32, i32
  }
  func.func @transform_5(%arg0: i32) -> (i32, i32) {
    %c0_i32 = arith.constant 0 : i32
    %c0_i32_0 = arith.constant 0 : i32
    %c0_i32_1 = arith.constant 0 : i32
    return %c0_i32, %c0_i32_0 : i32, i32
  }
  func.func @transform_6(%arg0: i32) -> (i32, i32) {
    %c0_i32 = arith.constant 0 : i32
    %c0_i32_0 = arith.constant 0 : i32
    %c0_i32_1 = arith.constant 0 : i32
    return %c0_i32, %c0_i32_0 : i32, i32
  }
  func.func @transform_7(%arg0: i32) -> (i32, i32) {
    %c0_i32 = arith.constant 0 : i32
    %c0_i32_0 = arith.constant 0 : i32
    %c0_i32_1 = arith.constant 0 : i32
    return %c0_i32, %c0_i32_0 : i32, i32
  }
  func.func @transform_8(%arg0: i32) -> (i32, i32) {
    %c0_i32 = arith.constant 0 : i32
    %c0_i32_0 = arith.constant 0 : i32
    %c0_i32_1 = arith.constant 0 : i32
    return %c0_i32, %c0_i32_0 : i32, i32
  }
  func.func @transform_9(%arg0: i32) -> (i32, i32) {
    %c0_i32 = arith.constant 0 : i32
    %c0_i32_0 = arith.constant 0 : i32
    %c0_i32_1 = arith.constant 0 : i32
    return %c0_i32, %c0_i32_0 : i32, i32
  }
  func.func @transform_10(%arg0: i32) -> (i32, i32) {
    %c0_i32 = arith.constant 0 : i32
    %c0_i32_0 = arith.constant 0 : i32
    %c0_i32_1 = arith.constant 0 : i32
    return %c0_i32, %c0_i32_0 : i32, i32
  }
  func.func @transform_11(%arg0: i32) -> (i32, i32) {
    %c0_i32 = arith.constant 0 : i32
    %c0_i32_0 = arith.constant 0 : i32
    return %arg0, %c0_i32 : i32, i32
  }
}

</mosaic_0001>

<bundles_post_ra>
// kernel: tpu_custom_call.1
= control target key start
LH: loop header
LB: loop body
LE: loop exit
PB: predicated region body
PF: predicated region fallthrough
CT: control target
= control target key end

     0   :  { %vm55_vm0 = vcmask 1046528   ;;  %s1464_s14 = smov 32   ;;  %vm73_vm1 = vcmask 1045504   ;;  %s2087_s0 = inlined_call_operand.vmem [shape: f32[64,32], index: 0, kind: input, shape index: {}]   ;;  %s2088_s1 = inlined_call_operand.vmem [shape: f32[64,4], index: 1, kind: input, shape index: {}]   ;;  %s2089_s2 = inlined_call_operand.vmem [shape: f32[1,4], index: 2, kind: input, shape index: {}]   ;;  %s2090_s3 = inlined_call_operand.vmem [shape: f32[96,4], index: 3, kind: input, shape index: {}]   ;;  %s2091_s4 = inlined_call_operand.vmem [shape: f32[1,4], index: 4, kind: input, shape index: {}]   ;;  %s2092_s5 = inlined_call_operand.vmem [shape: f32[128,4], index: 5, kind: input, shape index: {}]   ;;  %s2093_s6 = inlined_call_operand.vmem [shape: f32[1,4], index: 6, kind: input, shape index: {}]   ;;  %s2094_s7 = inlined_call_operand.vmem [shape: f32[12,128], index: 7, kind: input, shape index: {}]   ;;  %s2095_s8 = inlined_call_operand.vmem [shape: f32[1,128], index: 8, kind: input, shape index: {}]   ;;  %s2096_s9 = inlined_call_operand.vmem [shape: f32[128,128], index: 9, kind: input, shape index: {}]   ;;  %s2097_s10 = inlined_call_operand.vmem [shape: f32[1,128], index: 10, kind: input, shape index: {}]   ;;  %s2098_s11 = inlined_call_operand.hbm [shape: f32[8,128], index: 11, kind: output, shape index: {}]  }
   0x1   :  { %v1535_v0 = vld [vmem:[%s2087_s0 + $0x10] sm:$0xff]  ;;  %v1540_v1 = vld [vmem:[%s2087_s0 + $0x18] sm:$0xff]  ;;  %v1545_v2 = vld [vmem:[%s2087_s0] sm:$0xff] }
   0x2   :  { %v59_v3 = vrot.slane %v1535_v0, 1  ;;  %v61_v4 = vrot.slane %v1540_v1, 1  ;;  %v1552_v5 = vld [vmem:[%s2087_s0 + $0x8] sm:$0xff]  ;;  %v56_v6 = vrot.slane %v1545_v2, 1  ;;  %v1558_v7 = vld [vmem:[%s2087_s0 + $0x20] sm:$0xff]  ;;  %v1570_v11 = vld [vmem:[%s2087_s0 + $0x30] sm:$0xff] }
   0x3   :  { %v57_v8 = vrot.slane %v1552_v5, 1  ;;  %v63_v9 = vrot.slane %v1558_v7, 1  ;;  %v1565_v10 = vld [vmem:[%s2087_s0 + $0x28] sm:$0xff]  ;;  %v116_v13 = vld [vmem:[%s2088_s1 + $0x38] sm:$0xff]  ;;  %v115_v15 = vld [vmem:[%s2088_s1 + $0x30] sm:$0xff]  ;;  %v67_v18 = vrot.slane %v1570_v11, 1 }
   0x4   :  { %v62_v12 = vsel %vm55_vm0, %v59_v3, %v61_v4  ;;  %v65_v17 = vrot.slane %v1565_v10, 1  ;;  %1264 = vmatprep.subr.mxu0 %v116_v13  ;;  %v391_v19 = vld [vmem:[%s2090_s3 + $0x58] sm:$0xff]  ;;  %v114_v22 = vld [vmem:[%s2088_s1 + $0x28] sm:$0xff]  ;;  %v390_v23 = vld [vmem:[%s2090_s3 + $0x50] sm:$0xff]  ;;  %v75_v32 = vrot.slane %v1552_v5, 2  ;;  %v77_v33 = vrot.slane %v1535_v0, 2 }
   0x5   :  { %123 = vrot.lane.b32.xlu1 %v62_v12, %s1464_s14  ;;  %v58_v14 = vsel %vm55_vm0, %v56_v6, %v57_v8  ;;  %v64_v16 = vsel %vm55_vm0, %v61_v4, %v63_v9  ;;  %v60_v20 = vsel %vm55_vm0, %v57_v8, %v59_v3  ;;  %v1592_v21 = vld [vmem:[%s2087_s0 + $0x38] sm:$0xff]  ;;  %1265 = vmatpush3.msra.mxu0 %v116_v13  ;;  %v113_v26 = vld [vmem:[%s2088_s1 + $0x20] sm:$0xff]  ;;  %v389_v29 = vld [vmem:[%s2090_s3 + $0x48] sm:$0xff]  ;;  %v74_v35 = vrot.slane %v1545_v2, 2 }
   0x6   :  { %119 = vrot.lane.b32.xlu0 %v58_v14, %s1464_s14  ;;  %1292 = vmatprep.subr.mxu1 %v391_v19  ;;  %v68_v24 = vsel %vm55_vm0, %v65_v17, %v67_v18  ;;  %v69_v25 = vrot.slane %v1592_v21, 1  ;;  %v66_v27 = vsel %vm55_vm0, %v63_v9, %v65_v17  ;;  %v112_v28 = vld [vmem:[%s2088_s1 + $0x18] sm:$0xff]  ;;  %v111_v34 = vld [vmem:[%s2088_s1 + $0x10] sm:$0xff]  ;;  %v92_v36 = vrot.slane %v1545_v2, 3 }
   0x7   :  { %1266 = vmatprep.subr.mxu0 %v115_v15  ;;  %1293 = vmatpush3.msra.mxu1 %v391_v19  ;;  %v93_v37 = vrot.slane %v1552_v5, 3  ;;  %v95_v38 = vrot.slane %v1535_v0, 3 }
   0x8   :  { %1267 = vmatpush3.msra.mxu0 %v115_v15  ;;  %1294 = vmatprep.subr.mxu1 %v390_v23  ;;  %v72_v30 = vsel %vm55_vm0, %v69_v25, 0.0  ;;  %v70_v31 = vsel %vm55_vm0, %v67_v18, %v69_v25 }
   0x9   :  { %125 = vrot.lane.b32.xlu1 %v64_v16, %s1464_s14  ;;  %1268 = vmatprep.subr.mxu0 %v114_v22 }
   0xa   :  { %121 = vrot.lane.b32.xlu0 %v60_v20, %s1464_s14  ;;  %1269 = vmatpush3.msra.mxu0 %v114_v22 }
   0xb   :  { %1295 = vmatpush3.msra.mxu1 %v390_v23  ;;  %1270 = vmatprep.subr.mxu0 %v113_v26 }
   0xc   :  { %1271 = vmatpush3.msra.mxu0 %v113_v26  ;;  %1296 = vmatprep.subr.mxu1 %v389_v29 }
   0xd   :  { %129 = vrot.lane.b32.xlu1 %v68_v24, %s1464_s14  ;;  %1272 = vmatprep.subr.mxu0 %v112_v28 }
   0xe   :  { %127 = vrot.lane.b32.xlu0 %v66_v27, %s1464_s14 }
   0xf   :  { %16 = vsyncpa [#allocation3], 0  ;;  %vm91_vm2 = vcmask 1044480   ;;  %1273 = vmatpush3.msra.mxu0 %v112_v28  ;;  %1297 = vmatpush3.msra.mxu1 %v389_v29  ;;  %v110_v39 = vld [vmem:[%s2088_s1 + $0x8] sm:$0xff]  ;;  %v388_v40 = vld [vmem:[%s2090_s3 + $0x40] sm:$0xff]  ;;  %v79_v41 = vrot.slane %v1540_v1, 2  ;;  %v78_v42 = vsel %vm73_vm1, %v75_v32, %v77_v33  ;;  %v76_v46 = vsel %vm73_vm1, %v74_v35, %v75_v32 }
  0x10   :  { %1274 = vmatprep.subr.mxu0 %v111_v34  ;;  %v97_v43 = vrot.slane %v1540_v1, 3  ;;  %v99_v44 = vrot.slane %v1558_v7, 3  ;;  %v109_v45 = vld [vmem:[%s2088_s1] sm:$0xff]  ;;  %v94_v47 = vsel %vm91_vm2, %v92_v36, %v93_v37  ;;  %v96_v48 = vsel %vm91_vm2, %v93_v37, %v95_v38  ;;  %1298 = vmatprep.subr.mxu1 %v388_v40  ;;  %v387_v49 = vld [vmem:[%s2090_s3 + $0x38] sm:$0xff]  ;;  %s1465_s21 = smov 64   ;;  %v386_v51 = vld [vmem:[%s2090_s3 + $0x30] sm:$0xff] }
  0x11   :  { %133 = vrot.lane.b32.xlu1 %v72_v30, %s1464_s14  ;;  %1275 = vmatpush3.msra.mxu0 %v111_v34  ;;  %v80_v50 = vsel %vm73_vm1, %v77_v33, %v79_v41  ;;  %v1656_v52 = vld [vmem:[%s2092_s5 + $0x78] sm:$0xff]  ;;  %v1422_v53 = vpack.i.bf16 %v96_v48, %v94_v47  ;;  %v81_v56 = vrot.slane %v1558_v7, 2  ;;  %v385_v57 = vld [vmem:[%s2090_s3 + $0x28] sm:$0xff]  ;;  %v384_v59 = vld [vmem:[%s2090_s3 + $0x20] sm:$0xff]  ;;  %s1466_s28 = smov 96   ;;  %v83_v60 = vrot.slane %v1565_v10, 2 }
  0x12   :  { %131 = vrot.lane.b32.xlu0 %v70_v31, %s1464_s14  ;;  %1276 = vmatprep.subr.mxu0 %v110_v39  ;;  %v98_v54 = vsel %vm91_vm2, %v95_v38, %v97_v43  ;;  %v100_v55 = vsel %vm91_vm2, %v97_v43, %v99_v44  ;;  %v85_v61 = vrot.slane %v1570_v11, 2  ;;  %v101_v63 = vrot.slane %v1565_v10, 3  ;;  %v383_v4 = vld [vmem:[%s2090_s3 + $0x18] sm:$0xff]  ;;  %v382_v6 = vld [vmem:[%s2090_s3 + $0x10] sm:$0xff]  ;;  %v381_v16 = vld [vmem:[%s2090_s3 + $0x8] sm:$0xff]  ;;  %s1468_s16 = smov 4  }
  0x13   :  { %1277 = vmatpush3.msra.mxu0 %v110_v39  ;;  %1299 = vmatpush3.msra.mxu1 %v388_v40  ;;  %v1427_v58 = vpack.i.bf16 %v100_v55, %v98_v54  ;;  %v82_v62 = vsel %vm73_vm1, %v79_v41, %v81_v56  ;;  %v103_v3 = vrot.slane %v1570_v11, 3  ;;  %v87_v9 = vrot.slane %v1592_v21, 2  ;;  %v380_v17 = vld [vmem:[%s2090_s3] sm:$0xff]  ;;  %v665_v32 = vld [vmem:[%s2092_s5 + $0x70] sm:$0xff]  ;;  %v660_v41 = vld [vmem:[%s2092_s5 + $0x48] sm:$0xff]  ;;  %s1470_s22 = smov 8  }
  0x14   :  { %1278 = vmatprep.subr.mxu0 %v109_v45  ;;  %1300 = vmatprep.subr.mxu1 %v387_v49  ;;  %v86_v8 = vsel %vm73_vm1, %v83_v60, %v85_v61  ;;  %v105_v12 = vrot.slane %v1592_v21, 3  ;;  %v84_v13 = vsel %vm73_vm1, %v81_v56, %v83_v60  ;;  %v102_v14 = vsel %vm91_vm2, %v99_v44, %v101_v63  ;;  %v661_v39 = vld [vmem:[%s2092_s5 + $0x50] sm:$0xff]  ;;  %v655_v55 = vld [vmem:[%s2092_s5 + $0x20] sm:$0xff] }
  0x15   :  { %396 = vrot.lane.b32.xlu1 %v78_v42, %s1465_s21  ;;  %1279 = vmatpush3.msra.mxu0 %v109_v45  ;;  %v104_v15 = vsel %vm91_vm2, %v101_v63, %v103_v3  ;;  %v88_v18 = vsel %vm73_vm1, %v85_v61, %v87_v9  ;;  %v90_v24 = vsel %vm73_vm1, %v87_v9, 0.0  ;;  %vm143_vm3 = vcmask 261120   ;;  %v658_v45 = vld [vmem:[%s2092_s5 + $0x38] sm:$0xff]  ;;  %v653_v61 = vld [vmem:[%s2092_s5 + $0x10] sm:$0xff]  ;;  %v652_v63 = vld [vmem:[%s2092_s5 + $0x8] sm:$0xff] }
  0x16   :  { %394 = vrot.lane.b32.xlu0 %v76_v46, %s1465_s21  ;;  %1301 = vmatpush3.msra.mxu1 %v387_v49  ;;  %v1432_v19 = vpack.i.bf16 %v104_v15, %v102_v14  ;;  %v106_v20 = vsel %vm91_vm2, %v103_v3, %v105_v12  ;;  %v108_v22 = vsel %vm91_vm2, %v105_v12, 0.0  ;;  %vm158_vm4 = vcmask 523264   ;;  %v657_v49 = vld [vmem:[%s2092_s5 + $0x30] sm:$0xff] }
  0x17   :  { %1302 = vmatprep.subr.mxu1 %v386_v51  ;;  %1328 = vmatprep.subr.mxu0 %v1656_v52  ;;  %v1437_v23 = vpack.i.bf16 %v108_v22, %v106_v20  ;;  %vm432_vm5 = vcmask 785408   ;;  %vm976_vm6 = vcmask 1043456   ;;  %vm323_vm9 = vcmask 31744  }
  0x18   :  { %1303 = vmatpush3.msra.mxu1 %v386_v51  ;;  %vm909_vm0 = vcmask 1041409  }
  0x19   :  { %398 = vrot.lane.b32.xlu1 %v80_v50, %s1465_s21  ;;  %1304 = vmatprep.subr.mxu1 %v385_v57 }
  0x1a   :  { %1423 = vrot.lane.b32.xlu0 %v1422_v53, %s1466_s28  ;;  %1305 = vmatpush3.msra.mxu1 %v385_v57  ;;  %v654_v57 = vld [vmem:[%s2092_s5 + $0x18] sm:$0xff] }
  0x1b   :  { %1306 = vmatprep.subr.mxu1 %v384_v59 }
  0x1c   :  { %1307 = vmatpush3.msra.mxu1 %v384_v59 }
  0x1d   :  { %1428 = vrot.lane.b32.xlu1 %v1427_v58, %s1466_s28  ;;  %1308 = vmatprep.subr.mxu1 %v383_v4 }
  0x1e   :  { %400 = vrot.lane.b32.xlu0 %v82_v62, %s1465_s21  ;;  %1309 = vmatpush3.msra.mxu1 %v383_v4 }
  0x1f   :  { %1310 = vmatprep.subr.mxu1 %v382_v6 }
  0x20   :  { %1311 = vmatpush3.msra.mxu1 %v382_v6 }
  0x21   :  { %404 = vrot.lane.b32.xlu1 %v86_v8, %s1465_s21  ;;  %1312 = vmatprep.subr.mxu1 %v381_v16  ;;  %v651_v8 = vld [vmem:[%s2092_s5] sm:$0xff] }
  0x22   :  { %402 = vrot.lane.b32.xlu0 %v84_v13, %s1465_s21  ;;  %1313 = vmatpush3.msra.mxu1 %v381_v16 }
  0x23   :  { %1314 = vmatprep.subr.mxu1 %v380_v17 }
  0x24   :  { %1315 = vmatpush3.msra.mxu1 %v380_v17 }
  0x25   :  { %406 = vrot.lane.b32.xlu1 %v88_v18, %s1465_s21 }
  0x26   :  { %1433 = vrot.lane.b32.xlu0 %v1432_v19, %s1466_s28 }
  0x29   :  { %1438 = vrot.lane.b32.xlu1 %v1437_v23, %s1466_s28 }
  0x2a   :  { %408 = vrot.lane.b32.xlu0 %v90_v24, %s1465_s21 }
  0x77   :  { %v124_v25 = vpop.permute.xlu1 %123 }
  0x78   :  { %v120_v26 = vpop.permute.xlu0 %119  ;;  %v146_v29 = vsel %vm143_vm3, %v1535_v0, %v124_v25  ;;  %v664_v0 = vld [vmem:[%s2092_s5 + $0x68] sm:$0xff] }
  0x79   :  { %v144_v27 = vsel %vm143_vm3, %v1545_v2, %v120_v26 }
  0x7a   :  { %1280 = vmatprep.mubr.msk.f32.mxu0 %vm158_vm4, %v144_v27 }
  0x7b   :  { %v126_v28 = vpop.permute.xlu1 %125 }
  0x7c   :  { %v122_v30 = vpop.permute.xlu0 %121  ;;  %v147_v33 = vsel %vm143_vm3, %v1540_v1, %v126_v28  ;;  %v663_v1 = vld [vmem:[%s2092_s5 + $0x60] sm:$0xff]  ;;  %v964_v28 = vld [vmem:[%s2094_s7 + $0x8] sm:$0xf] }
  0x7d   :  { %v145_v31 = vsel %vm143_vm3, %v1552_v5, %v122_v30  ;;  %v312_v30 = vlaneseq }
  0x7e   :  { %1281 = vmatmul.mubr.msk.f32.vlgmr.msra.gmra.mxu0 %vm158_vm4, %v145_v31 }
  0x7f   :  { %1329 = vmatpush3.msra.mxu0 %v1656_v52  ;;  %v130_v2 = vpop.permute.xlu1 %129  ;;  %1283 = vmatprep.mubr.msk.f32.mxu0 %vm158_vm4, %v146_v29  ;;  %v656_v52 = vld [vmem:[%s2092_s5 + $0x28] sm:$0xff] }
  0x80   :  { %1330 = vmatprep.subr.mxu0 %v665_v32  ;;  %v128_v5 = vpop.permute.xlu0 %127  ;;  %v149_v35 = vsel %vm143_vm3, %v1565_v10, %v130_v2 }
  0x81   :  { %1331 = vmatpush3.msra.mxu0 %v665_v32  ;;  %v1726_v34 = vsel %vm143_vm3, %v1558_v7, %v128_v5  ;;  %v662_v7 = vld [vmem:[%s2092_s5 + $0x58] sm:$0xff]  ;;  %v1819_v32 = vshrl.u32 %v312_v30, 7 }
  0x82   :  { %1332 = vmatprep.subr.mxu0 %v664_v0  ;;  %1284 = vmatmul.mubr.msk.f32.gmra.mxu0 %vm158_vm4, %v147_v33 }
  0x83   :  { %1333 = vmatpush3.msra.mxu0 %v664_v0  ;;  %v134_v36 = vpop.permute.xlu1 %133  ;;  %1286 = vmatprep.mubr.msk.f32.mxu0 %vm158_vm4, %v1726_v34  ;;  %vm314_vm8 = vcmp.lt.s32.totalorder %v1819_v32, 7  ;;  %vm586_vm1 = vcmp.lt.s32.totalorder %v1819_v32, 6 }
  0x84   :  { %1334 = vmatprep.subr.mxu0 %v663_v1  ;;  %v132_v37 = vpop.permute.xlu0 %131  ;;  %v1747_v10 = vsel %vm143_vm3, %v1592_v21, %v134_v36  ;;  %v659_v21 = vld [vmem:[%s2092_s5 + $0x40] sm:$0xff] }
  0x85   :  { %1335 = vmatpush3.msra.mxu0 %v663_v1  ;;  %v150_v38 = vsel %vm143_vm3, %v1570_v11, %v132_v37 }
  0x86   :  { %1336 = vmatprep.subr.mxu0 %v662_v7  ;;  %1287 = vmatmul.mubr.msk.f32.gmra.mxu0 %vm158_vm4, %v149_v35 }
  0x87   :  { %1337 = vmatpush3.msra.mxu0 %v662_v7  ;;  %v397_v40 = vpop.permute.xlu1 %396  ;;  %1289 = vmatprep.mubr.msk.f32.mxu0 %vm158_vm4, %v150_v38 }
  0x88   :  { %1338 = vmatprep.subr.mxu0 %v661_v39  ;;  %v395_v11 = vpop.permute.xlu0 %394  ;;  %v419_v42 = vsel %vm158_vm4, %v145_v31, %v397_v40  ;;  %v1817_v31 = vld [vmem:[%s2089_s2] ss:$0 sm:$0xff] }
  0x89   :  { %1339 = vmatpush3.msra.mxu0 %v661_v39  ;;  %v418_v43 = vsel %vm158_vm4, %v144_v27, %v395_v11 }
  0x8a   :  { %1340 = vmatprep.subr.mxu0 %v660_v41  ;;  %1290 = vmatmul.mubr.msk.f32.gmra.mxu0 %vm158_vm4, %v1747_v10 }
  0x8b   :  { %1316 = vmatprep.mubr.msk.f32.mxu1 %vm432_vm5, %v418_v43  ;;  %1341 = vmatpush3.msra.mxu0 %v660_v41  ;;  %v399_v44 = vpop.permute.xlu1 %398 }
  0x8c   :  { %1317 = vmatmul.mubr.msk.f32.vlgmr.msra.gmra.mxu1 %vm432_vm5, %v419_v42  ;;  %1342 = vmatprep.subr.mxu0 %v659_v21  ;;  %v420_v46 = vsel %vm158_vm4, %v146_v29, %v399_v44  ;;  %v1424_v47 = vpop.permute.xlu0 %1423  ;;  %v1467_v29 = vmov 0.0  }
  0x8d   :  { %1343 = vmatpush3.msra.mxu0 %v659_v21  ;;  %v1425_v48 = vunpack.i.l.bf16 %v1424_v47  ;;  %1319 = vmatprep.mubr.msk.f32.mxu1 %vm432_vm5, %v420_v46  ;;  %v1426_v6 = vunpack.i.h.bf16 %v1424_v47 }
  0x8e   :  { %1344 = vmatprep.subr.mxu0 %v658_v45  ;;  %1379 = vmatprep.subr.mxu1 %v1467_v29 }
  0x8f   :  { %1345 = vmatpush3.msra.mxu0 %v658_v45  ;;  %v1429_v50 = vpop.permute.xlu1 %1428  ;;  %v693_v51 = vsel %vm432_vm5, %v418_v43, %v1425_v48  ;;  %v694_v15 = vsel %vm432_vm5, %v419_v42, %v1426_v6 }
  0x90   :  { %1346 = vmatprep.subr.mxu0 %v657_v49  ;;  %v401_v53 = vpop.permute.xlu0 %400  ;;  %1360 = vmatprep.mubr.f32.mxu0 %v693_v51  ;;  %v1430_v9 = vunpack.i.l.bf16 %v1429_v50  ;;  %v1431_v13 = vunpack.i.h.bf16 %v1429_v50 }
  0x91   :  { %1347 = vmatpush3.msra.mxu0 %v657_v49  ;;  %v421_v54 = vsel %vm158_vm4, %v147_v33, %v401_v53 }
  0x92   :  { %1348 = vmatprep.subr.mxu0 %v656_v52  ;;  %1320 = vmatmul.mubr.msk.f32.gmra.mxu1 %vm432_vm5, %v421_v54  ;;  %v695_v17 = vsel %vm432_vm5, %v420_v46, %v1430_v9  ;;  %v696_v20 = vsel %vm432_vm5, %v421_v54, %v1431_v13 }
  0x93   :  { %1349 = vmatpush3.msra.mxu0 %v656_v52  ;;  %v405_v56 = vpop.permute.xlu1 %404 }
  0x94   :  { %1350 = vmatprep.subr.mxu0 %v655_v55  ;;  %v423_v58 = vsel %vm158_vm4, %v149_v35, %v405_v56  ;;  %v403_v59 = vpop.permute.xlu0 %402 }
  0x95   :  { %1351 = vmatpush3.msra.mxu0 %v655_v55  ;;  %v422_v60 = vsel %vm158_vm4, %v1726_v34, %v403_v59 }
  0x96   :  { %1352 = vmatprep.subr.mxu0 %v654_v57  ;;  %1322 = vmatprep.mubr.msk.f32.mxu1 %vm432_vm5, %v422_v60 }
  0x97   :  { %1353 = vmatpush3.msra.mxu0 %v654_v57  ;;  %1323 = vmatmul.mubr.msk.f32.gmra.mxu1 %vm432_vm5, %v423_v58  ;;  %v407_v62 = vpop.permute.xlu1 %406 }
  0x98   :  { %1354 = vmatprep.subr.mxu0 %v653_v61  ;;  %v424_v3 = vsel %vm158_vm4, %v150_v38, %v407_v62  ;;  %v1434_v4 = vpop.permute.xlu0 %1433 }
  0x99   :  { %1355 = vmatpush3.msra.mxu0 %v653_v61  ;;  %1325 = vmatprep.mubr.msk.f32.mxu1 %vm432_vm5, %v424_v3  ;;  %v1435_v16 = vunpack.i.l.bf16 %v1434_v4  ;;  %v1436_v19 = vunpack.i.h.bf16 %v1434_v4 }
  0x9a   :  { %1356 = vmatprep.subr.mxu0 %v652_v63 }
  0x9b   :  { %1357 = vmatpush3.msra.mxu0 %v652_v63  ;;  %v1439_v18 = vpop.permute.xlu1 %1438  ;;  %v697_v23 = vsel %vm432_vm5, %v422_v60, %v1435_v16  ;;  %v698_v25 = vsel %vm432_vm5, %v423_v58, %v1436_v19  ;;  %v1846_v16 = vld [vmem:[%s2091_s4] ss:$0 sm:$0xff] }
  0x9c   :  { %1358 = vmatprep.subr.mxu0 %v651_v8  ;;  %v409_v12 = vpop.permute.xlu0 %408  ;;  %v1440_v22 = vunpack.i.l.bf16 %v1439_v18  ;;  %v1441_v24 = vunpack.i.h.bf16 %v1439_v18 }
  0x9d   :  { %1359 = vmatpush3.msra.mxu0 %v651_v8  ;;  %v425_v14 = vsel %vm158_vm4, %v1747_v10, %v409_v12 }
  0x9e   :  { %1361 = vmatmul.mubr.f32.vlgmr.msra.gmra.mxu0 %v694_v15  ;;  %1326 = vmatmul.mubr.msk.f32.gmra.mxu1 %vm432_vm5, %v425_v14  ;;  %v699_v26 = vsel %vm432_vm5, %v424_v3, %v1440_v22  ;;  %v700_v27 = vsel %vm432_vm5, %v425_v14, %v1441_v24 }
  0x9f   :  { %1363 = vmatprep.mubr.f32.mxu0 %v695_v17  ;;  %1372 = vmatprep.subr.mxu0 %v1467_v29 }
  0xa0   :  { %1373 = vmatpush3.msk.msra.mxu0 %vm976_vm6, %v964_v28 }
  0xa1   :  { %1374 = vmatprep.subr.mxu0 %v1467_v29 }
  0xa2   :  { %1364 = vmatmul.mubr.f32.gmra.mxu0 %v696_v20 }
  0xa3   :  { %1366 = vmatprep.mubr.f32.mxu0 %v697_v23 }
  0xa6   :  { %1367 = vmatmul.mubr.f32.gmra.mxu0 %v698_v25 }
  0xa7   :  { %1369 = vmatprep.mubr.f32.mxu0 %v699_v26 }
  0xaa   :  { %1370 = vmatmul.mubr.f32.gmra.mxu0 %v700_v27 }
 0x13e   :  { %v1282_v33 = vpop.f32.mrf.mxu0 }
 0x13f   :  { %v255_v2 = vadd.f32 %v1282_v33, %v1817_v31 }
 0x140   :  { %v249_v0 = vpop.f32.mrf.mxu0 }
 0x141   :  { %vm289_vm7 = vcmp.gt.f32.partialorder %v255_v2, 0.0  ;;  %v297_v5 = vmul.f32 0.01, %v255_v2  ;;  %v250_v34 = vadd.f32 %v1817_v31, %v249_v0 }
 0x142   :  { %v1285_v1 = vpop.f32.mrf.mxu0 }
 0x143   :  { %v305_v35 = vsel %vm289_vm7, %v255_v2, %v297_v5  ;;  %vm288_vm10 = vcmp.gt.f32.partialorder %v250_v34, 0.0  ;;  %v296_v36 = vmul.f32 0.01, %v250_v34  ;;  %v265_v7 = vadd.f32 %v1285_v1, %v1817_v31 }
 0x144   :  { %v316_v37 = vsel %vm314_vm8, %v305_v35, -inf  ;;  %v259_v38 = vpop.f32.mrf.mxu0  ;;  %vm836_vm7 = vcmp.lt.s32.totalorder %v1819_v32, 5 }
 0x145   :  { %v331_v39 = vsel %vm323_vm9, %v316_v37, -inf  ;;  %v304_v10 = vsel %vm288_vm10, %v250_v34, %v296_v36  ;;  %vm291_vm11 = vcmp.gt.f32.partialorder %v265_v7, 0.0  ;;  %v299_v40 = vmul.f32 0.01, %v265_v7 }
 0x146   :  { %v332_v41 = vrot.slane %v331_v39, 4  ;;  %v315_v11 = vsel %vm314_vm8, %v304_v10, -inf  ;;  %v260_v42 = vadd.f32 %v1817_v31, %v259_v38  ;;  %v1288_v43 = vpop.f32.mrf.mxu0 }
 0x147   :  { %v324_v21 = vsel %vm323_vm9, %v315_v11, -inf  ;;  %v307_v44 = vsel %vm291_vm11, %v265_v7, %v299_v40  ;;  %v275_v45 = vadd.f32 %v1288_v43, %v1817_v31 }
 0x148   :  { %v333_v46 = vmax.f32 %v331_v39, %v332_v41  ;;  %v325_v47 = vrot.slane %v324_v21, 4  ;;  %v318_v48 = vsel %vm314_vm8, %v307_v44, -inf  ;;  %vm290_vm12 = vcmp.gt.f32.partialorder %v260_v42, 0.0  ;;  %v269_v49 = vpop.f32.mrf.mxu0 }
 0x149   :  { %v345_v50 = vsel %vm323_vm9, %v318_v48, -inf  ;;  %v298_v51 = vmul.f32 0.01, %v260_v42  ;;  %vm293_vm13 = vcmp.gt.f32.partialorder %v275_v45, 0.0  ;;  %v301_v52 = vmul.f32 0.01, %v275_v45 }
 0x14a   :  { %v334_v53 = vrot.slane %v333_v46, 2  ;;  %v326_v54 = vmax.f32 %v324_v21, %v325_v47  ;;  %v346_v55 = vrot.slane %v345_v50, 4  ;;  %v270_v56 = vadd.f32 %v1817_v31, %v269_v49  ;;  %v1291_v57 = vpop.f32.mrf.mxu0 }
 0x14b   :  { %v306_v58 = vsel %vm290_vm12, %v260_v42, %v298_v51  ;;  %v309_v59 = vsel %vm293_vm13, %v275_v45, %v301_v52  ;;  %v285_v60 = vadd.f32 %v1291_v57, %v1817_v31 }
 0x14c   :  { %v335_v61 = vmax.f32 %v333_v46, %v334_v53  ;;  %v327_v62 = vrot.slane %v326_v54, 2  ;;  %v347_v63 = vmax.f32 %v345_v50, %v346_v55  ;;  %v317_v3 = vsel %vm314_vm8, %v306_v58, -inf  ;;  %v1318_v4 = vpop.f32.mrf.mxu1  ;;  %v279_v36 = vpop.f32.mrf.mxu0 }
 0x14d   :  { %v338_v6 = vsel %vm323_vm9, %v317_v3, -inf  ;;  %v320_v8 = vsel %vm314_vm8, %v309_v59, -inf  ;;  %vm292_vm14 = vcmp.gt.f32.partialorder %v270_v56, 0.0  ;;  %v300_v9 = vmul.f32 0.01, %v270_v56 }
 0x14e   :  { %v336_v12 = vrot.slane %v335_v61, 1  ;;  %v328_v13 = vmax.f32 %v326_v54, %v327_v62  ;;  %v348_v14 = vrot.slane %v347_v63, 2  ;;  %v339_v15 = vrot.slane %v338_v6, 4  ;;  %v523_v24 = vpop.f32.mrf.mxu1 }
 0x14f   :  { %v359_v17 = vsel %vm323_vm9, %v320_v8, -inf  ;;  %v308_v18 = vsel %vm292_vm14, %v270_v56, %v300_v9  ;;  %vm295_vm15 = vcmp.gt.f32.partialorder %v285_v60, 0.0  ;;  %v303_v19 = vmul.f32 0.01, %v285_v60 }
 0x150   :  { %v329_v20 = vrot.slane %v328_v13, 1  ;;  %v349_v22 = vmax.f32 %v347_v63, %v348_v14  ;;  %v340_v23 = vmax.f32 %v338_v6, %v339_v15  ;;  %v360_v25 = vrot.slane %v359_v17, 4 }
 0x151   :  { %v319_v26 = vsel %vm314_vm8, %v308_v18, -inf  ;;  %v311_v27 = vsel %vm295_vm15, %v285_v60, %v303_v19  ;;  %v529_v28 = vadd.f32 %v1318_v4, %v1846_v16  ;;  %v337_v30 = vmax.f32 %v335_v61, %v336_v12 }
 0x152   :  { %v330_v33 = vmax.f32 %v328_v13, %v329_v20  ;;  %v341_v2 = vrot.slane %v340_v23, 2  ;;  %v352_v0 = vsel %vm323_vm9, %v319_v26, -inf  ;;  %v1321_v5 = vpop.f32.mrf.mxu1  ;;  %v361_v34 = vmax.f32 %v359_v17, %v360_v25 }
 0x153   :  { %v353_v1 = vrot.slane %v352_v0, 4  ;;  %v322_v35 = vsel %vm314_vm8, %v311_v27, -inf  ;;  %vm563_vm2 = vcmp.gt.f32.partialorder %v529_v28, 0.0  ;;  %v350_v39 = vrot.slane %v349_v22, 1 }
 0x154   :  { %v1857_v7 = vsel %vm909_vm0, %v337_v30, %v330_v33  ;;  %v342_v37 = vmax.f32 %v340_v23, %v341_v2  ;;  %v373_v38 = vsel %vm323_vm9, %v322_v35, -inf  ;;  %v362_v10 = vrot.slane %v361_v34, 2  ;;  %v533_v43 = vpop.f32.mrf.mxu1 }
 0x155   :  { %v354_v40 = vmax.f32 %v352_v0, %v353_v1  ;;  %v571_v41 = vmul.f32 0.01, %v529_v28  ;;  %v280_v11 = vadd.f32 %v1817_v31, %v279_v36  ;;  %v524_v42 = vadd.f32 %v1846_v16, %v523_v24  ;;  %v1893_v36 = vld [vmem:[%s2093_s6] ss:$0 sm:$0xff] }
 0x156   :  { %v343_v21 = vrot.slane %v342_v37, 1  ;;  %v1862_v44 = vmax.f32 %v361_v34, %v362_v10  ;;  %v374_v45 = vrot.slane %v373_v38, 4  ;;  %v539_v49 = vadd.f32 %v1321_v5, %v1846_v16 }
 0x157   :  { %v579_v46 = vsel %vm563_vm2, %v529_v28, %v571_v41  ;;  %vm294_vm3 = vcmp.gt.f32.partialorder %v280_v11, 0.0  ;;  %v302_v48 = vmul.f32 0.01, %v280_v11  ;;  %v1867_v50 = vmax.f32 %v349_v22, %v350_v39  ;;  %v1324_v55 = vpop.f32.mrf.mxu1 }
 0x158   :  { %v588_v47 = vsel %vm586_vm1, %v579_v46, -inf  ;;  %v355_v51 = vrot.slane %v354_v40, 2  ;;  %vm562_vm4 = vcmp.gt.f32.partialorder %v524_v42, 0.0  ;;  %v570_v54 = vmul.f32 0.01, %v524_v42 }
 0x159   :  { %v602_v31 = vsel %vm323_vm9, %v588_v47, -inf  ;;  %v310_v53 = vsel %vm294_vm3, %v280_v11, %v302_v48  ;;  %v1870_v56 = vmax.f32 %v342_v37, %v343_v21  ;;  %v364_v57 = vrot.slane %v1862_v44, 1  ;;  %v543_v14 = vpop.f32.mrf.mxu1 }
 0x15a   :  { %v603_v52 = vrot.slane %v602_v31, 4  ;;  %v375_v58 = vmax.f32 %v373_v38, %v374_v45  ;;  %v321_v59 = vsel %vm314_vm8, %v310_v53, -inf  ;;  %v578_v62 = vsel %vm562_vm4, %v524_v42, %v570_v54 }
 0x15b   :  { %v366_v61 = vsel %vm323_vm9, %v321_v59, -inf  ;;  %vm565_vm5 = vcmp.gt.f32.partialorder %v539_v49, 0.0  ;;  %v356_v63 = vmax.f32 %v354_v40, %v355_v51  ;;  %v587_v4 = vsel %vm586_vm1, %v578_v62, -inf }
 0x15c   :  { %v604_v60 = vmax.f32 %v602_v31, %v603_v52  ;;  %v367_v3 = vrot.slane %v366_v61, 4  ;;  %v573_v6 = vmul.f32 0.01, %v539_v49  ;;  %v595_v9 = vsel %vm323_vm9, %v587_v4, -inf }
 0x15d   :  { %v534_v12 = vadd.f32 %v1846_v16, %v533_v43  ;;  %v549_v13 = vadd.f32 %v1324_v55, %v1846_v16  ;;  %v376_v17 = vrot.slane %v375_v58, 2  ;;  %v596_v19 = vrot.slane %v595_v9, 4 }
 0x15e   :  { %v605_v8 = vrot.slane %v604_v60, 2  ;;  %v1362_v15 = vpop.f32.mrf.mxu0  ;;  %v368_v18 = vmax.f32 %v366_v61, %v367_v3  ;;  %v581_v20 = vsel %vm565_vm5, %v539_v49, %v573_v6  ;;  %v544_v28 = vadd.f32 %v1846_v16, %v543_v14  ;;  %v1327_v40 = vpop.f32.mrf.mxu1 }
 0x15f   :  { %v590_v23 = vsel %vm586_vm1, %v581_v20, -inf  ;;  %vm564_vm6 = vcmp.gt.f32.partialorder %v534_v12, 0.0  ;;  %v572_v24 = vmul.f32 0.01, %v534_v12  ;;  %v597_v26 = vmax.f32 %v595_v9, %v596_v19 }
 0x160   :  { %v606_v22 = vmax.f32 %v604_v60, %v605_v8  ;;  %v773_v25 = vpop.f32.mrf.mxu0  ;;  %v616_v27 = vsel %vm323_vm9, %v590_v23, -inf  ;;  %vm567_vm8 = vcmp.gt.f32.partialorder %v549_v13, 0.0  ;;  %v357_v30 = vrot.slane %v356_v63, 1 }
 0x161   :  { %v617_v33 = vrot.slane %v616_v27, 4  ;;  %v580_v2 = vsel %vm564_vm6, %v534_v12, %v572_v24  ;;  %v575_v0 = vmul.f32 0.01, %v549_v13  ;;  %v1886_v5 = vmax.f32 %v375_v58, %v376_v17  ;;  %v553_v12 = vpop.f32.mrf.mxu1 }
 0x162   :  { %v369_v34 = vrot.slane %v368_v18, 2  ;;  %v598_v1 = vrot.slane %v597_v26, 2  ;;  %v589_v35 = vsel %vm586_vm1, %v580_v2, -inf  ;;  %v607_v37 = vrot.slane %v606_v22, 1  ;;  %v1365_v41 = vpop.f32.mrf.mxu0 }
 0x163   :  { %v618_v38 = vmax.f32 %v616_v27, %v617_v33  ;;  %v609_v39 = vsel %vm323_vm9, %v589_v35, -inf  ;;  %v583_v10 = vsel %vm567_vm8, %v549_v13, %v575_v0  ;;  %vm566_vm10 = vcmp.gt.f32.partialorder %v544_v28, 0.0 }
 0x164   :  { %v599_v11 = vmax.f32 %v597_v26, %v598_v1  ;;  %v610_v42 = vrot.slane %v609_v39, 4  ;;  %v592_v43 = vsel %vm586_vm1, %v583_v10, -inf  ;;  %v574_v46 = vmul.f32 0.01, %v544_v28  ;;  %v783_v55 = vpop.f32.mrf.mxu0 }
 0x165   :  { %v619_v21 = vrot.slane %v618_v38, 2  ;;  %v630_v45 = vsel %vm323_vm9, %v592_v43, -inf  ;;  %v779_v47 = vadd.f32 %v1362_v15, %v1893_v36  ;;  %v1900_v48 = vmax.f32 %v356_v63, %v357_v30 }
 0x166   :  { %v611_v49 = vmax.f32 %v609_v39, %v610_v42  ;;  %v631_v51 = vrot.slane %v630_v45, 4  ;;  %v559_v31 = vadd.f32 %v1327_v40, %v1846_v16  ;;  %v1903_v52 = vmax.f32 %v368_v18, %v369_v34  ;;  %v1368_v18 = vpop.f32.mrf.mxu0 }
 0x167   :  { %v582_v53 = vsel %vm566_vm10, %v544_v28, %v574_v46  ;;  %vm813_vm11 = vcmp.gt.f32.partialorder %v779_v47, 0.0  ;;  %v821_v54 = vmul.f32 0.01, %v779_v47  ;;  %v600_v58 = vrot.slane %v599_v11, 1 }
 0x168   :  { %v612_v59 = vrot.slane %v611_v49, 2  ;;  %v632_v60 = vmax.f32 %v630_v45, %v631_v51  ;;  %v591_v61 = vsel %vm586_vm1, %v582_v53, -inf  ;;  %v1907_v62 = vmax.f32 %v606_v22, %v607_v37  ;;  %v793_v1 = vpop.f32.mrf.mxu0 }
 0x169   :  { %v620_v63 = vmax.f32 %v618_v38, %v619_v21  ;;  %v623_v3 = vsel %vm323_vm9, %v591_v61, -inf  ;;  %v829_v4 = vsel %vm813_vm11, %v779_v47, %v821_v54  ;;  %vm569_vm12 = vcmp.gt.f32.partialorder %v559_v31, 0.0 }
 0x16a   :  { %v613_v6 = vmax.f32 %v611_v49, %v612_v59  ;;  %v624_v8 = vrot.slane %v623_v3, 4  ;;  %v838_v9 = vsel %vm836_vm7, %v829_v4, -inf  ;;  %v371_v13 = vrot.slane %v1903_v52, 1  ;;  %v1371_v51 = vpop.f32.mrf.mxu0 }
 0x16b   :  { %v852_v14 = vsel %vm323_vm9, %v838_v9, -inf  ;;  %v577_v15 = vmul.f32 0.01, %v559_v31  ;;  %v774_v17 = vadd.f32 %v1893_v36, %v773_v25  ;;  %v1915_v19 = vmax.f32 %v599_v11, %v600_v58 }
 0x16c   :  { %v633_v20 = vrot.slane %v632_v60, 2  ;;  %v625_v22 = vmax.f32 %v623_v3, %v624_v8  ;;  %v853_v23 = vrot.slane %v852_v14, 4  ;;  %v554_v27 = vadd.f32 %v1846_v16, %v553_v12 }
 0x16d   :  { %v585_v24 = vsel %vm569_vm12, %v559_v31, %v577_v15  ;;  %vm812_vm13 = vcmp.gt.f32.partialorder %v774_v17, 0.0  ;;  %v820_v26 = vmul.f32 0.01, %v774_v17  ;;  %v621_v28 = vrot.slane %v620_v63, 1 }
 0x16e   :  { %v614_v30 = vrot.slane %v613_v6, 1  ;;  %v626_v33 = vrot.slane %v625_v22, 2  ;;  %v854_v2 = vmax.f32 %v852_v14, %v853_v23  ;;  %v594_v0 = vsel %vm586_vm1, %v585_v24, -inf  ;;  %v803_v14 = vpop.f32.mrf.mxu0 }
 0x16f   :  { %v828_v34 = vsel %vm812_vm13, %v774_v17, %v820_v26  ;;  %vm568_vm14 = vcmp.gt.f32.partialorder %v554_v27, 0.0  ;;  %v576_v25 = vmul.f32 0.01, %v554_v27  ;;  %v1920_v35 = vmax.f32 %v632_v60, %v633_v20 }
 0x170   :  { %v855_v37 = vrot.slane %v854_v2, 2  ;;  %v644_v38 = vsel %vm323_vm9, %v594_v0, -inf  ;;  %v837_v39 = vsel %vm836_vm7, %v828_v34, -inf  ;;  %v789_v11 = vadd.f32 %v1365_v41, %v1893_v36 }
 0x171   :  { %v645_v16 = vrot.slane %v644_v38, 4  ;;  %v845_v10 = vsel %vm323_vm9, %v837_v39, -inf  ;;  %v584_v40 = vsel %vm568_vm14, %v554_v27, %v576_v25  ;;  %v1927_v42 = vmax.f32 %v620_v63, %v621_v28 }
 0x172   :  { %v1929_v43 = vmax.f32 %v625_v22, %v626_v33  ;;  %v846_v21 = vrot.slane %v845_v10, 4  ;;  %v593_v45 = vsel %vm586_vm1, %v584_v40, -inf  ;;  %v1933_v46 = vmax.f32 %v854_v2, %v855_v37 }
 0x173   :  { %v637_v47 = vsel %vm323_vm9, %v593_v45, -inf  ;;  %vm815_vm15 = vcmp.gt.f32.partialorder %v789_v11, 0.0  ;;  %v823_v49 = vmul.f32 0.01, %v789_v11  ;;  %v1936_v31 = vmax.f32 %v613_v6, %v614_v30 }
 0x174   :  { %v635_v53 = vrot.slane %v1920_v35, 1  ;;  %v847_v41 = vmax.f32 %v845_v10, %v846_v21  ;;  %v638_v54 = vrot.slane %v637_v47, 4  ;;  %v1939_v58 = vmax.f32 %v644_v38, %v645_v16 }
 0x175   :  { %v831_v59 = vsel %vm815_vm15, %v789_v11, %v823_v49  ;;  %v784_v60 = vadd.f32 %v1893_v36, %v783_v55  ;;  %v799_v61 = vadd.f32 %v1368_v18, %v1893_v36  ;;  %v628_v63 = vrot.slane %v1929_v43, 1 }
 0x176   :  { %v848_v3 = vrot.slane %v847_v41, 2  ;;  %v639_v4 = vmax.f32 %v637_v47, %v638_v54  ;;  %v840_v8 = vsel %vm836_vm7, %v831_v59, -inf  ;;  %v857_v6 = vrot.slane %v1933_v46, 1  ;;  %v963_v54 = vld [vmem:[%s2094_s7] sm:$0xff] }
 0x177   :  { %v866_v9 = vsel %vm323_vm9, %v840_v8, -inf  ;;  %vm814_vm1 = vcmp.gt.f32.partialorder %v784_v60, 0.0  ;;  %v822_v12 = vmul.f32 0.01, %v784_v60  ;;  %vm817_vm2 = vcmp.gt.f32.partialorder %v799_v61, 0.0  ;;  %1375 = vmatpush3.msra.mxu0 %v963_v54 }
 0x178   :  { %v640_v15 = vrot.slane %v639_v4, 2  ;;  %v867_v17 = vrot.slane %v866_v9, 4  ;;  %v825_v55 = vmul.f32 0.01, %v799_v61  ;;  %v647_v18 = vrot.slane %v1939_v58, 2 }
 0x179   :  { %v830_v20 = vsel %vm814_vm1, %v784_v60, %v822_v12  ;;  %v794_v22 = vadd.f32 %v1893_v36, %v793_v1  ;;  %v809_v23 = vadd.f32 %v1371_v51, %v1893_v36  ;;  %v849_v24 = vmax.f32 %v847_v41, %v848_v3 }
 0x17a   :  { %v868_v26 = vmax.f32 %v866_v9, %v867_v17  ;;  %v839_v27 = vsel %vm836_vm7, %v830_v20, -inf  ;;  %v804_v28 = vadd.f32 %v1893_v36, %v803_v14  ;;  %v833_v33 = vsel %vm817_vm2, %v799_v61, %v825_v55 }
 0x17b   :  { %v859_v30 = vsel %vm323_vm9, %v839_v27, -inf  ;;  %vm816_vm3 = vcmp.gt.f32.partialorder %v794_v22, 0.0  ;;  %v824_v2 = vmul.f32 0.01, %v794_v22  ;;  %v641_v0 = vmax.f32 %v639_v4, %v640_v15 }
 0x17c   :  { %v869_v34 = vrot.slane %v868_v26, 2  ;;  %v860_v25 = vrot.slane %v859_v30, 4  ;;  %v842_v1 = vsel %vm836_vm7, %v833_v33, -inf  ;;  %vm819_vm4 = vcmp.gt.f32.partialorder %v809_v23, 0.0 }
 0x17d   :  { %v880_v37 = vsel %vm323_vm9, %v842_v1, -inf  ;;  %v832_v38 = vsel %vm816_vm3, %v794_v22, %v824_v2  ;;  %v827_v39 = vmul.f32 0.01, %v809_v23  ;;  %vm911_vm5 = vcmask 1042434  }
 0x17e   :  { %v870_v16 = vmax.f32 %v868_v26, %v869_v34  ;;  %v861_v10 = vmax.f32 %v859_v30, %v860_v25  ;;  %v881_v40 = vrot.slane %v880_v37, 4  ;;  %v841_v36 = vsel %vm836_vm7, %v832_v38, -inf }
 0x17f   :  { %v873_v11 = vsel %vm323_vm9, %v841_v36, -inf  ;;  %v835_v21 = vsel %vm819_vm4, %v809_v23, %v827_v39  ;;  %vm818_vm6 = vcmp.gt.f32.partialorder %v804_v28, 0.0  ;;  %v826_v45 = vmul.f32 0.01, %v804_v28 }
 0x180   :  { %vm913_vm8 = vcmask 1043459   ;;  %v850_v47 = vrot.slane %v849_v24, 1  ;;  %v862_v49 = vrot.slane %v861_v10, 2  ;;  %v882_v51 = vmax.f32 %v880_v37, %v881_v40  ;;  %v1066_v40 = vld [vmem:[%s2096_s9 + $0x68] sm:$0xff] }
 0x181   :  { %v874_v41 = vrot.slane %v873_v11, 4  ;;  %vm915_vm10 = vcmask 1044484   ;;  %v629_v59 = vmax.f32 %v1929_v43, %v628_v63  ;;  %v871_v60 = vrot.slane %v870_v16, 1 }
 0x182   :  { %v844_v61 = vsel %vm836_vm7, %v835_v21, -inf  ;;  %v834_v3 = vsel %vm818_vm6, %v804_v28, %v826_v45  ;;  %vm917_vm11 = vcmask 1045509   ;;  %v858_v4 = vmax.f32 %v1933_v46, %v857_v6 }
 0x183   :  { %v863_v8 = vmax.f32 %v861_v10, %v862_v49  ;;  %v875_v9 = vmax.f32 %v873_v11, %v874_v41  ;;  %v642_v12 = vrot.slane %v641_v0, 1  ;;  %vm919_vm12 = vcmask 1046534  }
 0x184   :  { %v883_v14 = vrot.slane %v882_v51, 2  ;;  %v894_v15 = vsel %vm323_vm9, %v844_v61, -inf  ;;  %v843_v17 = vsel %vm836_vm7, %v834_v3, -inf  ;;  %v648_v43 = vmax.f32 %v1939_v58, %v647_v18  ;;  %v1063_v61 = vld [vmem:[%s2096_s9 + $0x50] sm:$0xff] }
 0x185   :  { %vm921_vm13 = vcmask 1047559   ;;  %v851_v63 = vmax.f32 %v849_v24, %v850_v47  ;;  %v864_v55 = vrot.slane %v863_v8, 1  ;;  %v876_v20 = vrot.slane %v875_v9, 2 }
 0x186   :  { %v895_v22 = vrot.slane %v894_v15, 4  ;;  %v872_v23 = vmax.f32 %v870_v16, %v871_v60  ;;  %v887_v46 = vsel %vm323_vm9, %v843_v17, -inf  ;;  %v636_v6 = vmax.f32 %v1920_v35, %v635_v53  ;;  %v1059_v17 = vld [vmem:[%s2096_s9 + $0x30] sm:$0xff] }
 0x187   :  { %v649_v26 = vrot.slane %v648_v43, 1  ;;  %v865_v27 = vmax.f32 %v863_v8, %v864_v55  ;;  %v877_v28 = vmax.f32 %v875_v9, %v876_v20  ;;  %v932_v32 = vsel %vm909_vm0, %v1907_v62, %v1915_v19  ;;  %v1068_v19 = vld [vmem:[%s2096_s9 + $0x78] sm:$0xff]  ;;  %v1062_v9 = vld [vmem:[%s2096_s9 + $0x48] sm:$0xff] }
 0x188   :  { %v896_v30 = vmax.f32 %v894_v15, %v895_v22  ;;  %v884_v58 = vmax.f32 %v882_v51, %v883_v14  ;;  %v888_v18 = vrot.slane %v887_v46, 4  ;;  %v643_v24 = vmax.f32 %v641_v0, %v642_v12  ;;  %1380 = vmatpush3.msra.mxu1 %v1068_v19  ;;  %v1061_v14 = vld [vmem:[%s2096_s9 + $0x40] sm:$0xff]  ;;  %v1060_v15 = vld [vmem:[%s2096_s9 + $0x38] sm:$0xff] }
 0x189   :  { %v933_v33 = vsel %vm911_vm5, %v1936_v31, %v932_v32  ;;  %v878_v2 = vrot.slane %v877_v28, 1  ;;  %v950_v35 = vsel %vm909_vm0, %v858_v4, %v851_v63  ;;  %v650_v1 = vmax.f32 %v648_v43, %v649_v26  ;;  %v1067_v31 = vld [vmem:[%s2096_s9 + $0x70] sm:$0xff]  ;;  %1381 = vmatprep.subr.mxu1 %v1467_v29  ;;  %v1058_v43 = vld [vmem:[%s2096_s9 + $0x28] sm:$0xff]  ;;  %v1057_v63 = vld [vmem:[%s2096_s9 + $0x20] sm:$0xff] }
 0x18a   :  { %v897_v34 = vrot.slane %v896_v30, 2  ;;  %v934_v25 = vsel %vm913_vm8, %v1927_v42, %v933_v33  ;;  %v889_v53 = vmax.f32 %v887_v46, %v888_v18  ;;  %v372_v62 = vmax.f32 %v1903_v52, %v371_v13  ;;  %1382 = vmatpush3.msra.mxu1 %v1067_v31  ;;  %v1056_v55 = vld [vmem:[%s2096_s9 + $0x18] sm:$0xff]  ;;  %v1054_v26 = vld [vmem:[%s2096_s9 + $0x8] sm:$0xff]  ;;  %v1183_v33 = vld [vmem:[%s2097_s10] ss:$0 sm:$0xff] }
 0x18b   :  { %v935_v37 = vsel %vm915_vm10, %v629_v59, %v934_v25  ;;  %v951_v38 = vsel %vm911_vm5, %v865_v27, %v950_v35  ;;  %v378_v39 = vrot.slane %v1886_v5, 1  ;;  %v879_v16 = vmax.f32 %v877_v28, %v878_v2  ;;  %1383 = vmatprep.subr.mxu1 %v1467_v29  ;;  %v1053_v27 = vld [vmem:[%s2096_s9] sm:$0xff] }
 0x18c   :  { %v936_v42 = vsel %vm917_vm11, %v636_v6, %v935_v37  ;;  %v898_v0 = vmax.f32 %v896_v30, %v897_v34  ;;  %v890_v10 = vrot.slane %v889_v53, 2  ;;  %v912_v13 = vsel %vm911_vm5, %v1870_v56, %v1857_v7  ;;  %1384 = vmatpush3.msra.mxu1 %v1066_v40  ;;  %v1055_v6 = vld [vmem:[%s2096_s9 + $0x10] sm:$0xff]  ;;  %v1180_v28 = vld [vmem:[%s2095_s8] ss:$0 sm:$0xff] }
 0x18d   :  { %v937_v52 = vsel %vm919_vm12, %v643_v24, %v936_v42  ;;  %v365_v36 = vmax.f32 %v1862_v44, %v364_v57  ;;  %v885_v11 = vrot.slane %v884_v58, 1  ;;  %v914_v45 = vsel %vm913_vm8, %v1867_v50, %v912_v13  ;;  %v1065_v44 = vld [vmem:[%s2096_s9 + $0x60] sm:$0xff]  ;;  %1385 = vmatprep.subr.mxu1 %v1467_v29 }
 0x18e   :  { %v938_v21 = vsel %vm921_vm13, %v650_v1, %v937_v52  ;;  %v891_v47 = vmax.f32 %v889_v53, %v890_v10  ;;  %v952_v7 = vsel %vm913_vm8, %v872_v23, %v951_v38  ;;  %v916_v56 = vsel %vm915_vm10, %v1900_v48, %v914_v45  ;;  %v1064_v48 = vld [vmem:[%s2096_s9 + $0x58] sm:$0xff]  ;;  %1386 = vmatpush3.msra.mxu1 %v1065_v44  ;;  %s1471_s9 = smov [#allocation2]  }
 0x18f   :  { %939 = vrot.lane.b32.xlu0 %v938_v21, %s1468_s16  ;;  %v899_v57 = vrot.slane %v898_v0, 1  ;;  %v379_v49 = vmax.f32 %v1886_v5, %v378_v39  ;;  %v918_v50 = vsel %vm917_vm11, %v365_v36, %v916_v56  ;;  %v953_v41 = vsel %vm915_vm10, %v879_v16, %v952_v7  ;;  %1387 = vmatprep.subr.mxu1 %v1467_v29  ;;  %s1153_s14 = sshll.u32 %s1471_s9, 4  ;;  %s1154_s14 = int_to_ptr.vmem [resolvable:$true] %s1153_s14 }
 0x190   :  { %v892_v51 = vrot.slane %v891_v47, 1  ;;  %v920_v54 = vsel %vm919_vm12, %v372_v62, %v918_v50  ;;  %vm1469_vm0 = vmmov 0   ;;  %v886_v59 = vmax.f32 %v884_v58, %v885_v11  ;;  %1388 = vmatpush3.msra.mxu1 %v1064_v48  ;;  %s1442_s20 = scalar_lea.vmem %s1154_s14, 128  ;;  %p1447_p1 = scmp.lt.s32.totalorder %s1154_s14, %s1154_s14 }
 0x191   :  { %1376 = vmatprep.mubr.msk.f32.mxu0 %vm1469_vm0, %v1467_v29  ;;  %v922_v5 = vsel %vm921_vm13, %v379_v49, %v920_v54  ;;  %1411 = vmatprep.mubr.msk.f32.mxu1 %vm1469_vm0, %v1467_v29  ;;  %v900_v3 = vmax.f32 %v898_v0, %v899_v57  ;;  %vm961_vm7 = vcmask 64512   ;;  %vm972_vm14 = vcmask 97280   ;;  %p1443_p0 = scmp.ne.s32.totalorder %s1154_s14, %s1442_s20  ;;  %p1448_p2 = scmp.lt.s32.totalorder %s1442_s20, %s1442_s20 }
 0x192   :  { %v893_v60 = vmax.f32 %v891_v47, %v892_v51  ;;  %v954_v4 = vsel %vm917_vm11, %v886_v59, %v953_v41  ;;  %1389 = vmatprep.subr.mxu1 %v1467_v29 }
 0x193   :  { %1390 = vmatpush3.msra.mxu1 %v1063_v61  ;;  %p1449_p3 = por %p1448_p2, %p1447_p1 }
 0x194   :  { %v955_v8 = vsel %vm919_vm12, %v893_v60, %v954_v4  ;;  %1391 = vmatprep.subr.mxu1 %v1467_v29 }
 0x195   :  { %v956_v12 = vsel %vm921_vm13, %v900_v3, %v955_v8  ;;  %1392 = vmatpush3.msra.mxu1 %v1062_v9  ;;  %p1450_p4 = pnand %p1449_p3, %p1443_p0 }
 0x196   :  { %957 = vrot.lane.b32.xlu1 %v956_v12, %s1470_s22  ;;  %1393 = vmatprep.subr.mxu1 %v1467_v29 }
 0x197   :  { %1394 = vmatpush3.msra.mxu1 %v1061_v14 }
 0x198   :  { %1395 = vmatprep.subr.mxu1 %v1467_v29 }
 0x199   :  { %1396 = vmatpush3.msra.mxu1 %v1060_v15 }
 0x19a   :  { %1397 = vmatprep.subr.mxu1 %v1467_v29 }
 0x19b   :  { %1398 = vmatpush3.msra.mxu1 %v1059_v17 }
 0x19c   :  { %1399 = vmatprep.subr.mxu1 %v1467_v29 }
 0x19d   :  { %1400 = vmatpush3.msra.mxu1 %v1058_v43 }
 0x19e   :  { %1401 = vmatprep.subr.mxu1 %v1467_v29 }
 0x19f   :  { %1402 = vmatpush3.msra.mxu1 %v1057_v63 }
 0x1a0   :  { %1403 = vmatprep.subr.mxu1 %v1467_v29 }
 0x1a1   :  { %1404 = vmatpush3.msra.mxu1 %v1056_v55 }
 0x1a2   :  { %1405 = vmatprep.subr.mxu1 %v1467_v29 }
 0x1a3   :  { %1406 = vmatpush3.msra.mxu1 %v1055_v6 }
 0x1a4   :  { %1407 = vmatprep.subr.mxu1 %v1467_v29 }
 0x1a5   :  { %1408 = vmatpush3.msra.mxu1 %v1054_v26 }
 0x1a6   :  { %1409 = vmatprep.subr.mxu1 %v1467_v29 }
 0x1a7   :  { %1410 = vmatpush3.msra.mxu1 %v1053_v27 }
 0x201   :  { %v940_v20 = vpop.permute.xlu0 %939 }
 0x202   :  { %v960_v22 = vsel %vm323_vm9, %v922_v5, %v940_v20 }
 0x208   :  { %v958_v23 = vpop.permute.xlu1 %957 }
 0x209   :  { %v962_v46 = vsel %vm961_vm7, %v960_v22, %v958_v23 }
 0x20a   :  { %1377 = vmatmul.mubr.msk.f32.vlgmr.msra.gmra.mxu0 %vm972_vm14, %v962_v46 }
 0x2ca   :  { %v1046_v30 = vpop.f32.mrf.mxu0 }
 0x2cb   :  { %v1047_v32 = vadd.f32 %v1180_v28, %v1046_v30 }
 0x2cc   :  { %v1378_v58 = vpop.f32.mrf.mxu0 }
 0x2cd   :  { %vm1050_vm9 = vcmp.gt.f32.partialorder %v1047_v32, 0.0  ;;  %v1051_v18 = vmul.f32 0.01, %v1047_v32 }
 0x2cf   :  { %v1052_v24 = vsel %vm1050_vm9, %v1047_v32, %v1051_v18 }
 0x2d0   :  { %1412 = vmatmul.mubr.f32.vlgmr.msra.gmra.mxu1 %v1052_v24 }
 0x390   :  { %v1142_v2 = vpop.f32.mrf.mxu1 }
 0x391   :  { %v1143_v29 = vadd.f32 %v1183_v33, %v1142_v2 }
 0x392   :  { %v1413_v34 = vpop.f32.mrf.mxu1 }
 0x393   :  { %1146 = vst [vmem:[#allocation2] sm:$0xff] %v1143_v29 }
 0x394   :  { %1453 = shalt.err (!%p1450_p4)
}
 0x395   :  { %1156 = dma.vmem_to_hbm [thread:$0]  %s1154_s14, 128, %s2098_s11, [#allocation3]  }
 0x396   :  { %1462 = dma.done.wait [#allocation3], 128  }
 0x397   :  { %1463 = vsyncadd [#allocation3], 4294967168 }
 0x398   :  { %1160 = vsyncpa [#allocation3], 1 }

</bundles_post_ra>
